<compile_context>
chip_gen: v5e
topology: v5e:2x2
jax: 0.10.0
libtpu: 0.0.40
codegen_flags: <defaults>
</compile_context>

<pallas_src>
import functools

import jax
import jax.numpy as jnp
from jax.experimental import pallas as pl
from jax.experimental.pallas import tpu as pltpu


def _round_up(x, m):
    return (x + m - 1) // m * m


def cvae_kernel(
    # batch-tiled inputs
    xsa_ref, state_ref, eps_ref,
    # VMEM-resident weights / biases
    we1_ref, be1_ref,
    we2_ref, be2_ref,
    whead_ref, bhead_ref,          # fused + lane-packed [mean | log_std] head
    wd1s_ref, wd1z_ref, bd1_ref,   # d1 split: state part / z part
    wd2_ref, bd2_ref,
    wd3_ref, bd3_ref,              # lane-packed into cols [0, action_dim)
    # output slab  [u | mean | log_std | zeros]  (lane-dense, width = round_up(A+2L,128))
    out_ref,
    *, max_action, action_dim, latent_dim,
):
    def mm(x, w_ref):
        # Matmul operands may be bf16 (compute_dtype); accumulate in f32 on the MXU.
        return jnp.dot(x.astype(w_ref.dtype), w_ref[...],
                       preferred_element_type=jnp.float32)

    xsa = xsa_ref[...]       # [TB, state+action]
    state = state_ref[...]   # [TB, state]
    eps = eps_ref[...]       # [TB, latent]

    # ---------------- encoder ----------------
    h = jnp.maximum(mm(xsa, we1_ref) + be1_ref[...], 0.0)   # relu(e1(cat(s,a)))
    h = jnp.maximum(mm(h, we2_ref) + be2_ref[...], 0.0)     # relu(e2(.))

    # Fused mean/log_std head, already placed at output-slab lanes:
    #   cols [A, A+L) = mean, cols [A+L, A+2L) = (unclipped) log_std, other cols = 0.
    head_slab = mm(h, whead_ref) + bhead_ref[...]            # [TB, out_width]

    mean = head_slab[:, action_dim:action_dim + latent_dim]
    log_std = jnp.clip(
        head_slab[:, action_dim + latent_dim:action_dim + 2 * latent_dim],
        -4.0, 15.0)
    z = mean + jnp.exp(log_std) * eps                        # reparameterization (f32)

    # ---------------- decoder ----------------
    a = jnp.maximum(mm(state, wd1s_ref) + mm(z, wd1z_ref) + bd1_ref[...], 0.0)
    a = jnp.maximum(mm(a, wd2_ref) + bd2_ref[...], 0.0)

    # d3 weights are lane-packed to cols [0, A); tanh(0) = 0 in all other lanes,
    # so u_slab + head_slab assembles the dense [u | mean | log_std | 0] output.
    u_slab = max_action * jnp.tanh(mm(a, wd3_ref) + bd3_ref[...])

    out_ref[...] = (u_slab + head_slab).astype(out_ref.dtype)


def cvae_forward(action, state, eps, params, *, max_action=1.0,
                 block_batch=256, compute_dtype=jnp.float32):
    """Pallas-backed CVAE.forward. Returns (u, mean, log_v)."""
    batch, action_dim = action.shape
    state_dim = state.shape[1]
    latent_dim = eps.shape[1]
    hidden = params["we2"].shape[0]

    # Batch tile: multiple of 8 sublanes; pad the batch up to a whole number of tiles.
    tb = _round_up(min(block_batch, batch), 8)
    batch_p = _round_up(batch, tb)
    num_tiles = batch_p // tb

    def pad_rows(x):
        return x if batch_p == batch else jnp.pad(x, ((0, batch_p - batch), (0, 0)))

    x_sa = pad_rows(jnp.concatenate([state, action], axis=1))   # e1 input (one dot)
    state_p = pad_rows(state)
    eps_p = pad_rows(eps)

    out_cols = action_dim + 2 * latent_dim
    out_width = _round_up(out_cols, 128)                        # lane-dense output slab

    # Fused + lane-packed head: mean at cols [A, A+L), log_std at [A+L, A+2L).
    w_head = jnp.zeros((hidden, out_width), jnp.float32)
    w_head = w_head.at[:, action_dim:action_dim + latent_dim].set(params["wm"])
    w_head = w_head.at[:, action_dim + latent_dim:out_cols].set(params["wls"])
    b_head = jnp.zeros((1, out_width), jnp.float32)
    b_head = b_head.at[:, action_dim:action_dim + latent_dim].set(params["bm"])
    b_head = b_head.at[:, action_dim + latent_dim:out_cols].set(params["bls"])
    # Lane-packed d3: u at cols [0, A).
    w_d3 = jnp.zeros((hidden, out_width), jnp.float32).at[:, :action_dim].set(params["wd3"])
    b_d3 = jnp.zeros((1, out_width), jnp.float32).at[:, :action_dim].set(params["bd3"])
    # d1 split (z produced in-kernel).
    wd1_s = params["wd1"][:state_dim]
    wd1_z = params["wd1"][state_dim:]

    cdt = compute_dtype   # only matmul operands are cast; biases/elementwise stay f32
    inputs = (
        x_sa, state_p, eps_p,
        params["we1"].astype(cdt), params["be1"],
        params["we2"].astype(cdt), params["be2"],
        w_head.astype(cdt), b_head,
        wd1_s.astype(cdt), wd1_z.astype(cdt), params["bd1"],
        params["wd2"].astype(cdt), params["bd2"],
        w_d3.astype(cdt), b_d3,
    )

    def tile_spec(feat):
        return pl.BlockSpec((tb, feat), lambda i: (i, 0))

    def resident_spec(arr):
        # Full-array block, constant block index -> stays VMEM-resident across tiles.
        return pl.BlockSpec(arr.shape, lambda i: (0, 0))

    in_specs = [tile_spec(state_dim + action_dim), tile_spec(state_dim),
                tile_spec(latent_dim)]
    in_specs += [resident_spec(a) for a in inputs[3:]]
    out_spec = pl.BlockSpec((tb, out_width), lambda i: (i, 0))

    flops = 2 * batch_p * (
        (state_dim + action_dim) * hidden + hidden * hidden + hidden * out_width
        + state_dim * hidden + latent_dim * hidden + hidden * hidden
        + hidden * out_width)
    transcendentals = batch_p * (latent_dim + out_width)
    bytes_accessed = (sum(int(a.size) * a.dtype.itemsize for a in inputs)
                      + batch_p * out_width * 4)

    slab = pl.pallas_call(
        functools.partial(cvae_kernel, max_action=float(max_action),
                          action_dim=action_dim, latent_dim=latent_dim),
        out_shape=jax.ShapeDtypeStruct((batch_p, out_width), jnp.float32),
        grid_spec=pltpu.PrefetchScalarGridSpec(
            num_scalar_prefetch=0,
            grid=(num_tiles,),
            in_specs=in_specs,
            out_specs=out_spec,
        ),
        compiler_params=pltpu.CompilerParams(
            dimension_semantics=("parallel",)),
        cost_estimate=pl.CostEstimate(flops=flops,
                                      transcendentals=transcendentals,
                                      bytes_accessed=bytes_accessed),
    )(*inputs)

    u = slab[:batch, :action_dim]
    mean = slab[:batch, action_dim:action_dim + latent_dim]
    # slab carries the *unclipped* log_std; recover log_v = 2 * clamp(log_std, -4, 15).
    log_v = 2.0 * jnp.clip(slab[:batch, action_dim + latent_dim:out_cols], -4.0, 15.0)
    return u, mean, log_v


def init_params(key, state_dim, action_dim, latent_dim, hidden_unit):
    """Deterministic init matching nn.Linear default (U[-1/sqrt(fan_in), +...]),
    stored as [in_features, out_features] so y = x @ W + b."""

    def linear(k, fan_in, fan_out):
        kw, kb = jax.random.split(k)
        bound = 1.0 / jnp.sqrt(fan_in)
        w = jax.random.uniform(kw, (fan_in, fan_out), jnp.float32, -bound, bound)
        b = jax.random.uniform(kb, (1, fan_out), jnp.float32, -bound, bound)
        return w, b

    keys = jax.random.split(key, 7)
    we1, be1 = linear(keys[0], state_dim + action_dim, hidden_unit)
    we2, be2 = linear(keys[1], hidden_unit, hidden_unit)
    wm, bm = linear(keys[2], hidden_unit, latent_dim)
    wls, bls = linear(keys[3], hidden_unit, latent_dim)
    wd1, bd1 = linear(keys[4], state_dim + latent_dim, hidden_unit)
    wd2, bd2 = linear(keys[5], hidden_unit, hidden_unit)
    wd3, bd3 = linear(keys[6], hidden_unit, action_dim)
    return {
        "we1": we1, "be1": be1, "we2": we2, "be2": be2,
        "wm": wm, "bm": bm, "wls": wls, "bls": bls,
        "wd1": wd1, "bd1": bd1, "wd2": wd2, "bd2": bd2,
        "wd3": wd3, "bd3": bd3,
    }


def reference_forward(action, state, eps, params, *, max_action=1.0):
    """Pure-JAX reference mirroring the PyTorch forward."""
    x = jnp.concatenate([state, action], axis=1)
    h = jnp.maximum(x @ params["we1"] + params["be1"], 0.0)
    h = jnp.maximum(h @ params["we2"] + params["be2"], 0.0)
    mean = h @ params["wm"] + params["bm"]
    log_std = jnp.clip(h @ params["wls"] + params["bls"], -4.0, 15.0)
    std = jnp.exp(log_std)
    log_v = 2.0 * log_std
    z = mean + std * eps
    xz = jnp.concatenate([state, z], axis=1)
    a = jnp.maximum(xz @ params["wd1"] + params["bd1"], 0.0)
    a = jnp.maximum(a @ params["wd2"] + params["bd2"], 0.0)
    u = max_action * jnp.tanh(a @ params["wd3"] + params["bd3"])
    return u, mean, log_v


if __name__ == "__main__":
    # Small, module-consistent shapes; batch=20 with block_batch=8 exercises both the
    # batch grid (3 tiles) and the pad-to-tile path.
    batch = 20
    state_dim = 16
    action_dim = 8
    latent_dim = 8
    hidden_unit = 32
    max_action = 1.0

    key = jax.random.PRNGKey(0)
    k_params, k_state, k_action, k_eps = jax.random.split(key, 4)

    params = init_params(k_params, state_dim, action_dim, latent_dim, hidden_unit)
    state = jax.random.normal(k_state, (batch, state_dim), jnp.float32)
    action = jax.random.normal(k_action, (batch, action_dim), jnp.float32)
    # torch.randn_like(std) equivalent, generated deterministically in the wrapper.
    eps = jax.random.normal(k_eps, (batch, latent_dim), jnp.float32)

    u, mean, log_v = cvae_forward(action, state, eps, params,
                                  max_action=max_action, block_batch=8)
    jax.block_until_ready((u, mean, log_v))

    u_ref, mean_ref, logv_ref = reference_forward(action, state, eps, params,
                                                  max_action=max_action)

    assert u.shape == (batch, action_dim)
    assert mean.shape == (batch, latent_dim)
    assert log_v.shape == (batch, latent_dim)
    assert jnp.allclose(u, u_ref, atol=1e-5, rtol=1e-5)
    assert jnp.allclose(mean, mean_ref, atol=1e-5, rtol=1e-5)
    assert jnp.allclose(log_v, logv_ref, atol=1e-5, rtol=1e-5)

    # bf16 matmul-operand path (v6e/v7x DMA/MXU win; elementwise math stays f32).
    u_bf, mean_bf, logv_bf = cvae_forward(action, state, eps, params,
                                          max_action=max_action, block_batch=8,
                                          compute_dtype=jnp.bfloat16)
    jax.block_until_ready((u_bf, mean_bf, logv_bf))
    assert bool(jnp.all(jnp.isfinite(u_bf)))
    assert bool(jnp.all(jnp.isfinite(mean_bf)))
    assert bool(jnp.all(jnp.isfinite(logv_bf)))
    assert jnp.allclose(u_bf, u_ref, atol=2e-1, rtol=2e-1)  # loose: bf16 operands

    # TODO(synk): CVAE.decode(state, z=None) (z ~ N(0,1).clamp(-0.5,0.5)) is not part of
    # forward() and is left to the wrapper if ever needed.

    print("KERNEL_OK")
</pallas_src>

<mosaic_0001>
module attributes {stable_mosaic.version = 11 : i64} {
  func.func @cvae_kernel(%arg0: i32, %arg1: memref<8x24xf32, #tpu.memory_space<vmem>>, %arg2: memref<8x16xf32, #tpu.memory_space<vmem>>, %arg3: memref<8x8xf32, #tpu.memory_space<vmem>>, %arg4: memref<24x32xf32, #tpu.memory_space<vmem>>, %arg5: memref<1x32xf32, #tpu.memory_space<vmem>>, %arg6: memref<32x32xf32, #tpu.memory_space<vmem>>, %arg7: memref<1x32xf32, #tpu.memory_space<vmem>>, %arg8: memref<32x128xf32, #tpu.memory_space<vmem>>, %arg9: memref<1x128xf32, #tpu.memory_space<vmem>>, %arg10: memref<16x32xf32, #tpu.memory_space<vmem>>, %arg11: memref<8x32xf32, #tpu.memory_space<vmem>>, %arg12: memref<1x32xf32, #tpu.memory_space<vmem>>, %arg13: memref<32x32xf32, #tpu.memory_space<vmem>>, %arg14: memref<1x32xf32, #tpu.memory_space<vmem>>, %arg15: memref<32x128xf32, #tpu.memory_space<vmem>>, %arg16: memref<1x128xf32, #tpu.memory_space<vmem>>, %arg17: memref<8x128xf32, #tpu.memory_space<vmem>>) attributes {dimension_semantics = [#tpu.dimension_semantics<parallel>], iteration_bounds = array<i64: 3>, scalar_prefetch = 0 : i64, scratch_operands = 0 : i64, tpu.core_type = #tpu.core_type<tc>, window_params = [{transform_indices = @transform_0, window_bounds = array<i64: 8, 24>}, {transform_indices = @transform_1, window_bounds = array<i64: 8, 16>}, {transform_indices = @transform_2, window_bounds = array<i64: 8, 8>}, {pipeline_mode = #tpu.pipeline_mode<synchronous>, transform_indices = @transform_3, window_bounds = array<i64: 24, 32>}, {pipeline_mode = #tpu.pipeline_mode<synchronous>, transform_indices = @transform_4, window_bounds = array<i64: 1, 32>}, {pipeline_mode = #tpu.pipeline_mode<synchronous>, transform_indices = @transform_5, window_bounds = array<i64: 32, 32>}, {pipeline_mode = #tpu.pipeline_mode<synchronous>, transform_indices = @transform_6, window_bounds = array<i64: 1, 32>}, {pipeline_mode = #tpu.pipeline_mode<synchronous>, transform_indices = @transform_7, window_bounds = array<i64: 32, 128>}, {pipeline_mode = #tpu.pipeline_mode<synchronous>, transform_indices = @transform_8, window_bounds = array<i64: 1, 128>}, {pipeline_mode = #tpu.pipeline_mode<synchronous>, transform_indices = @transform_9, window_bounds = array<i64: 16, 32>}, {pipeline_mode = #tpu.pipeline_mode<synchronous>, transform_indices = @transform_10, window_bounds = array<i64: 8, 32>}, {pipeline_mode = #tpu.pipeline_mode<synchronous>, transform_indices = @transform_11, window_bounds = array<i64: 1, 32>}, {pipeline_mode = #tpu.pipeline_mode<synchronous>, transform_indices = @transform_12, window_bounds = array<i64: 32, 32>}, {pipeline_mode = #tpu.pipeline_mode<synchronous>, transform_indices = @transform_13, window_bounds = array<i64: 1, 32>}, {pipeline_mode = #tpu.pipeline_mode<synchronous>, transform_indices = @transform_14, window_bounds = array<i64: 32, 128>}, {pipeline_mode = #tpu.pipeline_mode<synchronous>, transform_indices = @transform_15, window_bounds = array<i64: 1, 128>}, {transform_indices = @transform_16, window_bounds = array<i64: 8, 128>}]} {
    %c0 = arith.constant 0 : index
    %c0_0 = arith.constant 0 : index
    %0 = vector.load %arg1[%c0, %c0_0] : memref<8x24xf32, #tpu.memory_space<vmem>>, vector<8x24xf32>
    %c0_1 = arith.constant 0 : index
    %c0_2 = arith.constant 0 : index
    %1 = vector.load %arg2[%c0_1, %c0_2] : memref<8x16xf32, #tpu.memory_space<vmem>>, vector<8x16xf32>
    %c0_3 = arith.constant 0 : index
    %c0_4 = arith.constant 0 : index
    %2 = vector.load %arg3[%c0_3, %c0_4] : memref<8x8xf32, #tpu.memory_space<vmem>>, vector<8x8xf32>
    %c0_5 = arith.constant 0 : index
    %c0_6 = arith.constant 0 : index
    %3 = vector.load %arg4[%c0_5, %c0_6] : memref<24x32xf32, #tpu.memory_space<vmem>>, vector<24x32xf32>
    %cst = arith.constant dense<0.000000e+00> : vector<8x32xf32>
    %4 = tpu.matmul %0, %3, %cst {dimension_numbers = #tpu.dot_dimension_numbers<[1], [0], [0], [1], [0, 0, 1, 1], [], []>} : vector<8x24xf32>, vector<24x32xf32>, vector<8x32xf32> -> vector<8x32xf32>
    %c0_7 = arith.constant 0 : index
    %c0_8 = arith.constant 0 : index
    %5 = vector.load %arg5[%c0_7, %c0_8] : memref<1x32xf32, #tpu.memory_space<vmem>>, vector<1x32xf32>
    %6 = vector.broadcast %5 : vector<1x32xf32> to vector<8x32xf32>
    %7 = arith.addf %4, %6 : vector<8x32xf32>
    %cst_9 = arith.constant 0.000000e+00 : f32
    %8 = vector.broadcast %cst_9 : f32 to vector<8x32xf32>
    %9 = arith.maximumf %7, %8 : vector<8x32xf32>
    %c0_10 = arith.constant 0 : index
    %c0_11 = arith.constant 0 : index
    %10 = vector.load %arg6[%c0_10, %c0_11] : memref<32x32xf32, #tpu.memory_space<vmem>>, vector<32x32xf32>
    %cst_12 = arith.constant dense<0.000000e+00> : vector<8x32xf32>
    %11 = tpu.matmul %9, %10, %cst_12 {dimension_numbers = #tpu.dot_dimension_numbers<[1], [0], [0], [1], [0, 0, 1, 1], [], []>} : vector<8x32xf32>, vector<32x32xf32>, vector<8x32xf32> -> vector<8x32xf32>
    %c0_13 = arith.constant 0 : index
    %c0_14 = arith.constant 0 : index
    %12 = vector.load %arg7[%c0_13, %c0_14] : memref<1x32xf32, #tpu.memory_space<vmem>>, vector<1x32xf32>
    %13 = vector.broadcast %12 : vector<1x32xf32> to vector<8x32xf32>
    %14 = arith.addf %11, %13 : vector<8x32xf32>
    %cst_15 = arith.constant 0.000000e+00 : f32
    %15 = vector.broadcast %cst_15 : f32 to vector<8x32xf32>
    %16 = arith.maximumf %14, %15 : vector<8x32xf32>
    %c0_16 = arith.constant 0 : index
    %c0_17 = arith.constant 0 : index
    %17 = vector.load %arg8[%c0_16, %c0_17] : memref<32x128xf32, #tpu.memory_space<vmem>>, vector<32x128xf32>
    %cst_18 = arith.constant dense<0.000000e+00> : vector<8x128xf32>
    %18 = tpu.matmul %16, %17, %cst_18 {dimension_numbers = #tpu.dot_dimension_numbers<[1], [0], [0], [1], [0, 0, 1, 1], [], []>} : vector<8x32xf32>, vector<32x128xf32>, vector<8x128xf32> -> vector<8x128xf32>
    %c0_19 = arith.constant 0 : index
    %c0_20 = arith.constant 0 : index
    %19 = vector.load %arg9[%c0_19, %c0_20] : memref<1x128xf32, #tpu.memory_space<vmem>>, vector<1x128xf32>
    %20 = vector.broadcast %19 : vector<1x128xf32> to vector<8x128xf32>
    %21 = arith.addf %18, %20 : vector<8x128xf32>
    %22 = vector.extract_strided_slice %21 {offsets = [0, 8], sizes = [8, 8], strides = [1, 1]} : vector<8x128xf32> to vector<8x8xf32>
    %23 = vector.extract_strided_slice %21 {offsets = [0, 16], sizes = [8, 8], strides = [1, 1]} : vector<8x128xf32> to vector<8x8xf32>
    %cst_21 = arith.constant -4.000000e+00 : f32
    %cst_22 = arith.constant 1.500000e+01 : f32
    %24 = vector.broadcast %cst_21 : f32 to vector<8x8xf32>
    %25 = arith.maximumf %24, %23 : vector<8x8xf32>
    %26 = vector.broadcast %cst_22 : f32 to vector<8x8xf32>
    %27 = arith.minimumf %26, %25 : vector<8x8xf32>
    %28 = math.exp %27 : vector<8x8xf32>
    %29 = arith.mulf %28, %2 : vector<8x8xf32>
    %30 = arith.addf %22, %29 : vector<8x8xf32>
    %c0_23 = arith.constant 0 : index
    %c0_24 = arith.constant 0 : index
    %31 = vector.load %arg10[%c0_23, %c0_24] : memref<16x32xf32, #tpu.memory_space<vmem>>, vector<16x32xf32>
    %cst_25 = arith.constant dense<0.000000e+00> : vector<8x32xf32>
    %32 = tpu.matmul %1, %31, %cst_25 {dimension_numbers = #tpu.dot_dimension_numbers<[1], [0], [0], [1], [0, 0, 1, 1], [], []>} : vector<8x16xf32>, vector<16x32xf32>, vector<8x32xf32> -> vector<8x32xf32>
    %c0_26 = arith.constant 0 : index
    %c0_27 = arith.constant 0 : index
    %33 = vector.load %arg11[%c0_26, %c0_27] : memref<8x32xf32, #tpu.memory_space<vmem>>, vector<8x32xf32>
    %cst_28 = arith.constant dense<0.000000e+00> : vector<8x32xf32>
    %34 = tpu.matmul %30, %33, %cst_28 {dimension_numbers = #tpu.dot_dimension_numbers<[1], [0], [0], [1], [0, 0, 1, 1], [], []>} : vector<8x8xf32>, vector<8x32xf32>, vector<8x32xf32> -> vector<8x32xf32>
    %35 = arith.addf %32, %34 : vector<8x32xf32>
    %c0_29 = arith.constant 0 : index
    %c0_30 = arith.constant 0 : index
    %36 = vector.load %arg12[%c0_29, %c0_30] : memref<1x32xf32, #tpu.memory_space<vmem>>, vector<1x32xf32>
    %37 = vector.broadcast %36 : vector<1x32xf32> to vector<8x32xf32>
    %38 = arith.addf %35, %37 : vector<8x32xf32>
    %cst_31 = arith.constant 0.000000e+00 : f32
    %39 = vector.broadcast %cst_31 : f32 to vector<8x32xf32>
    %40 = arith.maximumf %38, %39 : vector<8x32xf32>
    %c0_32 = arith.constant 0 : index
    %c0_33 = arith.constant 0 : index
    %41 = vector.load %arg13[%c0_32, %c0_33] : memref<32x32xf32, #tpu.memory_space<vmem>>, vector<32x32xf32>
    %cst_34 = arith.constant dense<0.000000e+00> : vector<8x32xf32>
    %42 = tpu.matmul %40, %41, %cst_34 {dimension_numbers = #tpu.dot_dimension_numbers<[1], [0], [0], [1], [0, 0, 1, 1], [], []>} : vector<8x32xf32>, vector<32x32xf32>, vector<8x32xf32> -> vector<8x32xf32>
    %c0_35 = arith.constant 0 : index
    %c0_36 = arith.constant 0 : index
    %43 = vector.load %arg14[%c0_35, %c0_36] : memref<1x32xf32, #tpu.memory_space<vmem>>, vector<1x32xf32>
    %44 = vector.broadcast %43 : vector<1x32xf32> to vector<8x32xf32>
    %45 = arith.addf %42, %44 : vector<8x32xf32>
    %cst_37 = arith.constant 0.000000e+00 : f32
    %46 = vector.broadcast %cst_37 : f32 to vector<8x32xf32>
    %47 = arith.maximumf %45, %46 : vector<8x32xf32>
    %c0_38 = arith.constant 0 : index
    %c0_39 = arith.constant 0 : index
    %48 = vector.load %arg15[%c0_38, %c0_39] : memref<32x128xf32, #tpu.memory_space<vmem>>, vector<32x128xf32>
    %cst_40 = arith.constant dense<0.000000e+00> : vector<8x128xf32>
    %49 = tpu.matmul %47, %48, %cst_40 {dimension_numbers = #tpu.dot_dimension_numbers<[1], [0], [0], [1], [0, 0, 1, 1], [], []>} : vector<8x32xf32>, vector<32x128xf32>, vector<8x128xf32> -> vector<8x128xf32>
    %c0_41 = arith.constant 0 : index
    %c0_42 = arith.constant 0 : index
    %50 = vector.load %arg16[%c0_41, %c0_42] : memref<1x128xf32, #tpu.memory_space<vmem>>, vector<1x128xf32>
    %51 = vector.broadcast %50 : vector<1x128xf32> to vector<8x128xf32>
    %52 = arith.addf %49, %51 : vector<8x128xf32>
    %53 = math.tanh %52 : vector<8x128xf32>
    %cst_43 = arith.constant 1.000000e+00 : f32
    %54 = vector.broadcast %cst_43 : f32 to vector<8x128xf32>
    %55 = arith.mulf %54, %53 : vector<8x128xf32>
    %56 = arith.addf %55, %21 : vector<8x128xf32>
    %c0_44 = arith.constant 0 : index
    %c0_45 = arith.constant 0 : index
    %57 = vector.load %arg17[%c0_44, %c0_45] : memref<8x128xf32, #tpu.memory_space<vmem>>, vector<8x128xf32>
    tpu.vector_store %arg17[%c0_44, %c0_45], %56 {strides = array<i32>} : memref<8x128xf32, #tpu.memory_space<vmem>>, vector<8x128xf32>,
    return
  }
  func.func @transform_0(%arg0: i32) -> (i32, i32) {
    %c0_i32 = arith.constant 0 : i32
    %c0_i32_0 = arith.constant 0 : i32
    return %arg0, %c0_i32 : i32, i32
  }
  func.func @transform_1(%arg0: i32) -> (i32, i32) {
    %c0_i32 = arith.constant 0 : i32
    %c0_i32_0 = arith.constant 0 : i32
    return %arg0, %c0_i32 : i32, i32
  }
  func.func @transform_2(%arg0: i32) -> (i32, i32) {
    %c0_i32 = arith.constant 0 : i32
    %c0_i32_0 = arith.constant 0 : i32
    return %arg0, %c0_i32 : i32, i32
  }
  func.func @transform_3(%arg0: i32) -> (i32, i32) {
    %c0_i32 = arith.constant 0 : i32
    %c0_i32_0 = arith.constant 0 : i32
    %c0_i32_1 = arith.constant 0 : i32
    return %c0_i32, %c0_i32_0 : i32, i32
  }
  func.func @transform_4(%arg0: i32) -> (i32, i32) {
    %c0_i32 = arith.constant 0 : i32
    %c0_i32_0 = arith.constant 0 : i32
    %c0_i32_1 = arith.constant 0 : i32
    return %c0_i32, %c0_i32_0 : i32, i32
  }
  func.func @transform_5(%arg0: i32) -> (i32, i32) {
    %c0_i32 = arith.constant 0 : i32
    %c0_i32_0 = arith.constant 0 : i32
    %c0_i32_1 = arith.constant 0 : i32
    return %c0_i32, %c0_i32_0 : i32, i32
  }
  func.func @transform_6(%arg0: i32) -> (i32, i32) {
    %c0_i32 = arith.constant 0 : i32
    %c0_i32_0 = arith.constant 0 : i32
    %c0_i32_1 = arith.constant 0 : i32
    return %c0_i32, %c0_i32_0 : i32, i32
  }
  func.func @transform_7(%arg0: i32) -> (i32, i32) {
    %c0_i32 = arith.constant 0 : i32
    %c0_i32_0 = arith.constant 0 : i32
    %c0_i32_1 = arith.constant 0 : i32
    return %c0_i32, %c0_i32_0 : i32, i32
  }
  func.func @transform_8(%arg0: i32) -> (i32, i32) {
    %c0_i32 = arith.constant 0 : i32
    %c0_i32_0 = arith.constant 0 : i32
    %c0_i32_1 = arith.constant 0 : i32
    return %c0_i32, %c0_i32_0 : i32, i32
  }
  func.func @transform_9(%arg0: i32) -> (i32, i32) {
    %c0_i32 = arith.constant 0 : i32
    %c0_i32_0 = arith.constant 0 : i32
    %c0_i32_1 = arith.constant 0 : i32
    return %c0_i32, %c0_i32_0 : i32, i32
  }
  func.func @transform_10(%arg0: i32) -> (i32, i32) {
    %c0_i32 = arith.constant 0 : i32
    %c0_i32_0 = arith.constant 0 : i32
    %c0_i32_1 = arith.constant 0 : i32
    return %c0_i32, %c0_i32_0 : i32, i32
  }
  func.func @transform_11(%arg0: i32) -> (i32, i32) {
    %c0_i32 = arith.constant 0 : i32
    %c0_i32_0 = arith.constant 0 : i32
    %c0_i32_1 = arith.constant 0 : i32
    return %c0_i32, %c0_i32_0 : i32, i32
  }
  func.func @transform_12(%arg0: i32) -> (i32, i32) {
    %c0_i32 = arith.constant 0 : i32
    %c0_i32_0 = arith.constant 0 : i32
    %c0_i32_1 = arith.constant 0 : i32
    return %c0_i32, %c0_i32_0 : i32, i32
  }
  func.func @transform_13(%arg0: i32) -> (i32, i32) {
    %c0_i32 = arith.constant 0 : i32
    %c0_i32_0 = arith.constant 0 : i32
    %c0_i32_1 = arith.constant 0 : i32
    return %c0_i32, %c0_i32_0 : i32, i32
  }
  func.func @transform_14(%arg0: i32) -> (i32, i32) {
    %c0_i32 = arith.constant 0 : i32
    %c0_i32_0 = arith.constant 0 : i32
    %c0_i32_1 = arith.constant 0 : i32
    return %c0_i32, %c0_i32_0 : i32, i32
  }
  func.func @transform_15(%arg0: i32) -> (i32, i32) {
    %c0_i32 = arith.constant 0 : i32
    %c0_i32_0 = arith.constant 0 : i32
    %c0_i32_1 = arith.constant 0 : i32
    return %c0_i32, %c0_i32_0 : i32, i32
  }
  func.func @transform_16(%arg0: i32) -> (i32, i32) {
    %c0_i32 = arith.constant 0 : i32
    %c0_i32_0 = arith.constant 0 : i32
    return %arg0, %c0_i32 : i32, i32
  }
}

</mosaic_0001>

<bundles_post_ra>
// kernel: tpu_custom_call.1
= control target key start
LH: loop header
LB: loop body
LE: loop exit
PB: predicated region body
PF: predicated region fallthrough
CT: control target
= control target key end

     0   :  { %s1940_s0 = inlined_call_operand.hbm [shape: f32[24,24], index: 0, kind: input, shape index: {}]   ;;  %s1941_s1 = inlined_call_operand.vmem [shape: f32[24,16], index: 1, kind: input, shape index: {}]   ;;  %s1942_s2 = inlined_call_operand.vmem [shape: f32[24,8], index: 2, kind: input, shape index: {}]   ;;  %s1943_s3 = inlined_call_operand.hbm [shape: f32[24,32], index: 3, kind: input, shape index: {}]   ;;  %s1944_s4 = inlined_call_operand.hbm [shape: f32[1,32], index: 4, kind: input, shape index: {}]   ;;  %s1945_s5 = inlined_call_operand.vmem [shape: f32[32,32], index: 5, kind: input, shape index: {}]   ;;  %s1946_s6 = inlined_call_operand.hbm [shape: f32[1,32], index: 6, kind: input, shape index: {}]   ;;  %s1947_s7 = inlined_call_operand.vmem [shape: f32[32,128], index: 7, kind: input, shape index: {}]   ;;  %s1948_s8 = inlined_call_operand.hbm [shape: f32[1,128], index: 8, kind: input, shape index: {}]   ;;  %s1949_s9 = inlined_call_operand.vmem [shape: f32[16,32], index: 9, kind: input, shape index: {}]   ;;  %s1950_s10 = inlined_call_operand.hbm [shape: f32[8,32], index: 10, kind: input, shape index: {}]   ;;  %s1951_s11 = inlined_call_operand.vmem [shape: f32[1,32], index: 11, kind: input, shape index: {}]   ;;  %s1952_s12 = inlined_call_operand.hbm [shape: f32[32,32], index: 12, kind: input, shape index: {}]   ;;  %s1953_s13 = inlined_call_operand.vmem [shape: f32[1,32], index: 13, kind: input, shape index: {}]   ;;  %s1954_s14 = inlined_call_operand.hbm [shape: f32[32,128], index: 14, kind: input, shape index: {}]   ;;  %s1955_s15 = inlined_call_operand.vmem [shape: f32[1,128], index: 15, kind: input, shape index: {}]   ;;  %s1956_s16 = inlined_call_operand.hbm [shape: f32[24,128], index: 16, kind: output, shape index: {}]  }
   0x1   :  { %1959 = sst [smem:[#allocation23_spill]] %s1940_s0 }
   0x2   :  { %1960 = sst [smem:[#allocation24_spill]] %s1941_s1 }
   0x3   :  { %1961 = sst [smem:[#allocation25_spill]] %s1943_s3 }
   0x4   :  { %1962 = sst [smem:[#allocation26_spill]] %s1944_s4 }
   0x5   :  { %1963 = sst [smem:[#allocation27_spill]] %s1946_s6 }
   0x6   :  { %1964 = sst [smem:[#allocation28_spill]] %s1948_s8 }
   0x7   :  { %1965 = sst [smem:[#allocation29_spill]] %s1950_s10 }
   0x8   :  { %1966 = sst [smem:[#allocation30_spill]] %s1951_s11 }
   0x9   :  { %1967 = sst [smem:[#allocation31_spill]] %s1953_s13 }
   0xa   :  { %1968 = sst [smem:[#allocation32_spill]] %s1955_s15 }
   0xb   :  { %1969 = sst [smem:[#allocation33_spill]] %s1956_s16 }
   0xc   :  { %21 = vsyncpa [#allocation3], 0 }
   0xd   :  { %23 = vsyncpa [#allocation3 + $0x1], 0 }
   0xe   :  { %24 = vsyncpa [#allocation6], 0 }
   0xf   :  { %25 = vsyncpa [#allocation9], 0 }
  0x10   :  { %26 = vsyncpa [#allocation12], 0 }
  0x11   :  { %27 = vsyncpa [#allocation15], 0 }
  0x12   :  { %28 = vsyncpa [#allocation4], 0 }
  0x13   :  { %30 = vsyncpa [#allocation4 + $0x1], 0  ;;  %s1682_s21 = smov 0   ;;  %s1684_s22 = smov 0  }
  0x14   :  { %s1686_s23 = smov 0   ;;  %s1688_s24 = smov 0  }
  0x15 LB: > { %s1970_s3 = sld [smem:[#allocation25_spill]]  ;;  %s1706_s28 = sadd.s32 4294967295, %s1584_s24   ;;  %s1584_s24 = sphi %s1688_s24, %s1990_s24   ;;  %s1580_s23 = sphi %s1686_s23, %s1989_s23   ;;  %s1576_s22 = sphi %s1684_s22, %s1988_s22   ;;  %s1572_s21 = sphi %s1682_s21, %s1987_s21  }
  0x16   : > { %p1097_p0 = scmp.ge.s32.totalorder %s1584_s24, 1  ;;  %p57_p1 = scmp.eq.s32.totalorder %s1706_s28, 0 }
  0x17   : > { %p418_p2 = scmp.lt.s32.totalorder %s1584_s24, 4  ;;  %s1586_s30 = smov [#allocation5]  }
  0x18   : > { %s431_s0 = sshll.u32 %s1586_s30, 4  ;;  %s1972_s6 = sld [smem:[#allocation27_spill]]  ;;  %s432_s0 = int_to_ptr.vmem [resolvable:$true] %s431_s0 }
  0x19   : > { %p1711_p3 = pnand %p1097_p0, %p418_p2  ;;  %s1974_s10 = sld [smem:[#allocation29_spill]] }
  0x1a   : > { %s1588_s15 = smov 128   ;;  %s1589_s13 = smov 8  }
  0x1b   : > { %s429_s27 = sshll.u32 %s1970_s3, 4  ;;  %p1163_p4 = pneg %p1711_p3  ;;  %s430_s27 = int_to_ptr.hbm [resolvable:$true] %s429_s27 }
  0x1c   : > { %s1587_s3 = smov [#allocation8]   ;;  %s1975_s4 = sld [smem:[#allocation26_spill]] }
  0x1d   : > { %p1722_p5 = pnand %p1163_p4, %p57_p1  ;;  %s461_s16 = sshll.u32 %s1587_s3, 4  ;;  %s462_s16 = int_to_ptr.vmem [resolvable:$true] %s461_s16 }
  0x1e   : > { %s459_s19 = sshll.u32 %s1972_s6, 4  ;;  %s1590_s25 = smov [#allocation11]   ;;  %s460_s19 = int_to_ptr.hbm [resolvable:$true] %s459_s19 }
  0x1f   : > { %s489_s30 = sshll.u32 %s1974_s10, 4  ;;  %s491_s26 = sshll.u32 %s1590_s25, 4  ;;  %s490_s30 = int_to_ptr.hbm [resolvable:$true] %s489_s30  ;;  %s492_s26 = int_to_ptr.vmem [resolvable:$true] %s491_s26 }
  0x20   : > { %1166 = dma.hbm_to_vmem [thread:$0]  (!%p1722_p5), %s430_s27, 384, %s432_s0, [#allocation6], %s1588_s15, %s1588_s15, %s1589_s13  }
  0x21   : > { %1172 = dma.hbm_to_vmem [thread:$0]  (!%p1722_p5), %s460_s19, 16, %s462_s16, [#allocation9]  }
  0x22   : > { %s444_s6 = sshll.u32 %s1975_s4, 4  ;;  %s1591_s3 = smov [#allocation7]   ;;  %s445_s6 = int_to_ptr.hbm [resolvable:$true] %s444_s6 }
  0x23   : > { %1178 = dma.hbm_to_vmem [thread:$0]  (!%p1722_p5), %s490_s30, 128, %s492_s26, [#allocation12]  }
  0x24   : > { %s446_s10 = sshll.u32 %s1591_s3, 4  ;;  %s1976_s8 = sld [smem:[#allocation28_spill]]  ;;  %s447_s10 = int_to_ptr.vmem [resolvable:$true] %s446_s10 }
  0x25   : > { %1169 = dma.hbm_to_vmem [thread:$0]  (!%p1722_p5), %s445_s6, 16, %s447_s10, [#allocation6]  }
  0x26   : > { %s503_s19 = sshll.u32 %s1952_s12, 4  ;;  %s1592_s17 = smov [#allocation10]   ;;  %s504_s19 = int_to_ptr.hbm [resolvable:$true] %s503_s19 }
  0x27   : > { %s476_s30 = sshll.u32 %s1592_s17, 4  ;;  %s1593_s1 = smov [#allocation13]   ;;  %s477_s30 = int_to_ptr.vmem [resolvable:$true] %s476_s30 }
  0x28   : > { %s505_s6 = sshll.u32 %s1593_s1, 4  ;;  %s520_s18 = sshll.u32 %s1954_s14, 4  ;;  %s506_s6 = int_to_ptr.vmem [resolvable:$true] %s505_s6  ;;  %s521_s18 = int_to_ptr.hbm [resolvable:$true] %s520_s18 }
  0x29   : > { %1181 = dma.hbm_to_vmem [thread:$0]  (!%p1722_p5), %s504_s19, 512, %s506_s6, [#allocation12], %s1588_s15, %s1588_s15, %s1589_s13  }
  0x2a   : > { %s474_s27 = sshll.u32 %s1976_s8, 4  ;;  %s1594_s25 = smov [#allocation14]   ;;  %s475_s27 = int_to_ptr.hbm [resolvable:$true] %s474_s27 }
  0x2b   : > { %1175 = dma.hbm_to_vmem [thread:$0]  (!%p1722_p5), %s475_s27, 16, %s477_s30, [#allocation9]  }
  0x2c   : > { %s522_s26 = sshll.u32 %s1594_s25, 4  ;;  %s1096_s3 = sadd.s32 4294967294, %s1584_s24   ;;  %s523_s26 = int_to_ptr.vmem [resolvable:$true] %s522_s26 }
  0x2d   : > { %1184 = dma.hbm_to_vmem [thread:$0]  (!%p1722_p5), %s521_s18, 512, %s523_s26, [#allocation15], %s1588_s15, %s1588_s15, %s1589_s13  }
  0x2e   : > { %s1766_s27 = sadd.s32 1, %s1584_s24   ;;  %s43_s16 = sadd.s32 1, %s1580_s23 }
  0x2f   : > { %s40_s0 = ssub.s32 %s1584_s24, %s1766_s27  ;;  %p50_p6 = scmp.ne.s32.totalorder %s1580_s23, %s1576_s22 }
  0x30   : > { %p41_p7 = scmp.eq.s32.totalorder %s40_s0, 0  ;;  %p51_p8 = scmp.eq.s32.totalorder %s1584_s24, 0 }
  0x31   : > { %p56_p9 = scmp.ne.s32.totalorder %s1576_s22, %s1572_s21  ;;  %p405_p10 = scmp.eq.s32.totalorder %s1706_s28, 2 }
  0x32   : > { %s1778_s19 = scalar_select %p41_p7, %s1580_s23, %s43_s16  }
  0x33   : > { %p1782_p11 = por %p57_p1, %p56_p9  ;;  %p1786_p12 = por %p405_p10, %p50_p6 }
  0x34   : > { %p411_p13 = scmp.eq.s32.totalorder %s1096_s3, 2  ;;  %p52_p0 = por %p51_p8, %p50_p6 }
  0x35   : > { %s539_s15 = sand.u32 1, %s1580_s23   ;;  %p1200_p4 = scmp.lt.s32.totalorder %s1584_s24, 3 }
  0x36   : > { %p1791_p2 = por %p411_p13, %p56_p9  ;;  %s1106_s30 = sshll.u32 %s539_s15, 3 }
  0x37   : > { %s1107_s1 = sshll.u32 %s1584_s24, 3  ;;  %s1980_s11 = sld [smem:[#allocation23_spill]] }
  0x38   : > { %s543_s26 = scalar_lea.vmem [#allocation2], %s1106_s30  ;;  %p1800_p5 = pnand %p1200_p4, %p52_p0 }
  0x39   : > { %s551_s16 = sshll.u32 %s543_s26, 4  ;;  %s540_s0 = scalar_lea.sflag [#allocation3], %s539_s15  ;;  %s552_s16 = int_to_ptr.vmem [resolvable:$true] %s551_s16 }
  0x3a   : > { %p1476_p7 = pneg %p1800_p5 }
  0x3d   : > { %s547_s18 = scalar_lea.hbm %s1980_s11, %s1107_s1  ;;  %s1479_s30 = scalar_lea.hbm %s1980_s11, 24 }
  0x3e   : > { %s549_s25 = sshll.u32 %s547_s18, 4  ;;  %s550_s25 = int_to_ptr.hbm [resolvable:$true] %s549_s25 }
  0x3f   : > { %s1472_s4 = sshra.s32 %s550_s25, 4  ;;  %s1473_s4 = int_to_ptr.hbm [resolvable:$true] %s1472_s4 }
  0x40   : > { %s1474_s8 = scalar_lea.hbm %s1473_s4, 8  ;;  %p1480_p10 = scmp.lt.s32.totalorder %s1473_s4, %s1980_s11 }
  0x41   : > { %p1475_p6 = scmp.ne.s32.totalorder %s1473_s4, %s1474_s8  ;;  %p1481_p13 = scmp.lt.s32.totalorder %s1479_s30, %s1474_s8 }
  0x43   : > { %p1477_p8 = pnand %p1476_p7, %p1475_p6  ;;  %p1482_p0 = por %p1481_p13, %p1480_p10 }
  0x45   : > { %p1478_p9 = pneg %p1477_p8 }
  0x47   : > { %p1483_p4 = pnand %p1482_p0, %p1478_p9 }
  0x49   : > { %1486 = shalt.err (!%p1483_p4)
}
  0x4a   : > { %1188 = dma.hbm_to_vmem [thread:$0]  (!%p1800_p5), %s550_s25, 128, %s552_s16, %s540_s0  }
  0x4b   : > { %574 = sbr.rel (%p1711_p3) target bundleno = 1152 (0x480), region = 84  ;;  %s1817_s15 = sand.u32 (!%p1711_p3), 1, %s1576_s22  }
  0x4c   : > { %s1109_s26 = sshll.u32 (!%p1711_p3), %s1817_s15, 3  ;;  %s577_s1 = scalar_lea.sflag (!%p1711_p3), [#allocation3], %s1817_s15 }
  0x4d   : > { %s580_s4 = scalar_lea.vmem (!%p1711_p3), [#allocation2], %s1109_s26 }
  0x50   : > { %1547 = dma.done.wait (%p1782_p11), %s577_s1, 128  }
  0x51   : > { %1549 = vsyncadd (%p1782_p11), %s577_s1, 4294967168 }
  0x52   : > { %1551 = dma.done.wait (%p57_p1), [#allocation6], 400  }
  0x53   : > { %1553 = vsyncadd (%p57_p1), [#allocation6], 4294966896 }
  0x54   : > { %1555 = dma.done.wait (%p57_p1), [#allocation9], 32  }
  0x55   : > { %1557 = vsyncadd (%p57_p1), [#allocation9], 4294967264 }
  0x56   : > { %1559 = dma.done.wait (%p57_p1), [#allocation12], 640  }
  0x57   : > { %1561 = vsyncadd (%p57_p1), [#allocation12], 4294966656 }
  0x58   : > { %1563 = dma.done.wait (%p57_p1), [#allocation15], 512  }
  0x59   : > { %1565 = vsyncadd (%p57_p1), [#allocation15], 4294966784  ;;  %v686_v0 = vld [vmem:[#allocation5 + $0x10] sm:$0xff]  ;;  %v685_v1 = vld [vmem:[#allocation5 + $0x8] sm:$0xff]  ;;  %vm691_vm0 = vcmask 195584   ;;  %vm724_vm1 = vcmask 261120  }
  0x5a   : > { %708 = vmatpush.msra.mxu0 %v686_v0  ;;  %v684_v2 = vld [vmem:[#allocation5] sm:$0xff]  ;;  %v719_v3 = vld [vmem:[%s1945_s5 + $0x18] sm:$0xff]  ;;  %v681_v4 = vld [vmem:[%s580_s4] sm:$0xff]  ;;  %p673_p1 = scmp.lt.s32.totalorder %s1706_s28, 2  ;;  %s1595_s30 = smov 16   ;;  %vm800_vm2 = vcmask 64512  }
  0x5b   : > { %740 = vmatpush.msra.mxu1 %v719_v3  ;;  %v718_v5 = vld [vmem:[%s1945_s5 + $0x10] sm:$0xff]  ;;  %v717_v6 = vld [vmem:[%s1945_s5 + $0x8] sm:$0xff]  ;;  %v716_v7 = vld [vmem:[%s1945_s5] sm:$0xff]  ;;  %s1596_s10 = smov 120   ;;  %vm823_vm3 = vcmask 130048   ;;  %s1984_s1 = sld [smem:[#allocation31_spill]] }
  0x5c   : > { %709 = vmatpush.msra.mxu0 %v685_v1  ;;  %v752_v8 = vld [vmem:[%s1947_s7 + $0x18] sm:$0xff]  ;;  %v1252_v9 = vld [vmem:[#allocation7] ss:$0 sm:$0xff]  ;;  %s1861_s18 = scalar_select %p673_p1, %s1706_s28, 2  ;;  %v751_v13 = vld [vmem:[%s1947_s7 + $0x10] sm:$0xff] }
  0x5d   : > { %741 = vmatpush.msra.mxu1 %v718_v5  ;;  %772 = vmatpush.msra.mxu2 %v752_v8  ;;  %v750_v14 = vld [vmem:[%s1947_s7 + $0x8] sm:$0xff]  ;;  %v749_v15 = vld [vmem:[%s1947_s7] sm:$0xff]  ;;  %v853_v40 = vld [vmem:[#allocation13] sm:$0xff]  ;;  %s1985_s20 = sld [smem:[#allocation32_spill]]  ;;  %s1128_s25 = sshll.u32 %s1706_s28, 3 }
  0x5e   : > { %710 = vmatpush.msra.mxu0 %v684_v2  ;;  %s1118_s8 = sshll.u32 %s1861_s18, 3  ;;  %v1253_v17 = vld [vmem:[#allocation8] ss:$0 sm:$0xff]  ;;  %v1254_v21 = vld [vmem:[#allocation10] ss:$0 sm:$0xff]  ;;  %v796_v30 = vld [vmem:[#allocation11] sm:$0xff] }
  0x5f   : > { %1120 = vmatmul.msk.f32.vlgmr.msra.gmra.mxu0 %vm691_vm0, %v681_v4  ;;  %742 = vmatpush.msra.mxu1 %v717_v6  ;;  %s680_s3 = scalar_lea.vmem %s1942_s2, %s1118_s8  ;;  %v795_v33 = vld [vmem:[%s1949_s9 + $0x8] sm:$0xff]  ;;  %v794_v34 = vld [vmem:[%s1949_s9] sm:$0xff]  ;;  %v885_v50 = vld [vmem:[#allocation14] sm:$0xff]  ;;  %s672_s6 = scalar_lea.vmem [#allocation16], %s1109_s26 }
  0x60   : > { %773 = vmatpush.msra.mxu2 %v751_v13  ;;  %v683_v16 = vld [vmem:[%s680_s3] sm:$0xff]  ;;  %818 = vmatpush.msra.mxu3 %v796_v30  ;;  %s1982_s3 = sld [smem:[#allocation24_spill]]  ;;  %v856_v37 = vld [vmem:[#allocation13 + $0x18] sm:$0xff] }
  0x61   : > { %743 = vmatpush.msra.mxu1 %v716_v7  ;;  %785 = vrot.lane.b32.xlu0 %v683_v16, %s1595_s30  ;;  %v855_v38 = vld [vmem:[#allocation13 + $0x10] sm:$0xff]  ;;  %v854_v39 = vld [vmem:[#allocation13 + $0x8] sm:$0xff]  ;;  %v888_v41 = vld [vmem:[#allocation14 + $0x18] sm:$0xff]  ;;  %s1983_s30 = sld [smem:[#allocation30_spill]] }
  0x62   : > { %774 = vmatpush.msra.mxu2 %v750_v14  ;;  %841 = vmatpush.msrb.mxu3 %v795_v33  ;;  %v887_v42 = vld [vmem:[#allocation14 + $0x10] sm:$0xff]  ;;  %v886_v49 = vld [vmem:[#allocation14 + $0x8] sm:$0xff] }
  0x63   : > { %876 = vmatpush.msrb.mxu0 %v856_v37  ;;  %908 = vmatpush.msrb.mxu1 %v888_v41  ;;  %v1256_v51 = vld [vmem:[%s1984_s1] ss:$0 sm:$0xff] }
  0x64   : > { %775 = vmatpush.msra.mxu2 %v749_v15  ;;  %842 = vmatpush.msrb.mxu3 %v794_v34  ;;  %v1257_v55 = vld [vmem:[%s1985_s20] ss:$0 sm:$0xff] }
  0x65   : > { %877 = vmatpush.msrb.mxu0 %v855_v38  ;;  %909 = vmatpush.msrb.mxu1 %v887_v42 }
  0x66   : > { %s676_s0 = scalar_lea.vmem %s1982_s3, %s1118_s8 }
  0x67   : > { %v682_v36 = vld [vmem:[%s676_s0] sm:$0xff]  ;;  %878 = vmatpush.msrb.mxu0 %v854_v39  ;;  %910 = vmatpush.msrb.mxu1 %v886_v49  ;;  %s1986_s0 = sld [smem:[#allocation33_spill]] }
  0x68   : > { %v1255_v44 = vld [vmem:[%s1983_s30] ss:$0 sm:$0xff]  ;;  %s932_s30 = sshll.u32 %s672_s6, 4  ;;  %s933_s30 = int_to_ptr.vmem [resolvable:$true] %s932_s30 }
  0x69   : > { %879 = vmatpush.msrb.mxu0 %v853_v40  ;;  %911 = vmatpush.msrb.mxu1 %v885_v50 }
  0x6d   : > { %s930_s18 = scalar_lea.hbm %s1986_s0, %s1128_s25  ;;  %s1522_s26 = scalar_lea.hbm %s1986_s0, 24 }
  0x6e   : > { %s934_s8 = sshll.u32 %s930_s18, 4  ;;  %s935_s8 = int_to_ptr.hbm [resolvable:$true] %s934_s8 }
  0x6f   : > { %s1516_s1 = sshra.s32 %s935_s8, 4  ;;  %s1517_s1 = int_to_ptr.hbm [resolvable:$true] %s1516_s1 }
  0x70   : > { %s1518_s28 = scalar_lea.hbm %s1517_s1, 8  ;;  %p1523_p6 = scmp.lt.s32.totalorder %s1517_s1, %s1986_s0 }
  0x71   : > { %p1519_p3 = scmp.ne.s32.totalorder %s1517_s1, %s1518_s28  ;;  %p1524_p7 = scmp.lt.s32.totalorder %s1522_s26, %s1518_s28 }
  0x73   : > { %p1520_p11 = pnand %p1519_p3, %p1786_p12  ;;  %p1525_p8 = por %p1524_p7, %p1523_p6 }
  0x75   : > { %p1521_p5 = pneg %p1520_p11 }
  0x77   : > { %p1526_p9 = pnand %p1525_p8, %p1521_p5 }
  0xd3   : > { %v786_v27 = vpop.permute.xlu0 %785 }
  0xdc   : > { %v712_v10 = vpop.f32.mrf.mxu0 }
  0xdd   : > { %v713_v11 = vadd.f32 %v1252_v9, %v712_v10 }
  0xdf   : > { %v715_v12 = vmax.f32 %v713_v11, 0.0 }
  0xe1   : > { %1121 = vmatmul.msk.f32.vlgmr.msra.gmra.mxu1 %vm724_vm1, %v715_v12 }
 0x15e   : > { %v745_v18 = vpop.f32.mrf.mxu1 }
 0x15f   : > { %v746_v19 = vadd.f32 %v1253_v17, %v745_v18 }
 0x161   : > { %v748_v20 = vmax.f32 %v746_v19, 0.0 }
 0x163   : > { %1122 = vmatmul.msk.f32.vlgmr.msra.gmra.mxu2 %vm724_vm1, %v748_v20 }
 0x1e6   : > { %v777_v22 = vpop.f32.mrf.mxu2 }
 0x1e7   : > { %v1879_v23 = vadd.f32 %v1254_v21, %v777_v22 }
 0x1e9   : > { %v780_v24 = vmax.f32 %v1879_v23, -4.0 }
 0x1eb   : > { %v781_v25 = vmin.f32 %v780_v24, 15.0 }
 0x1ed   : > { %v782_v26 = vmul.f32 1.442695, %v781_v25 }
 0x1ef   : > { %1258 = vpow2.f32 %v782_v26 }
 0x1f5   : > { %v1259_v28 = vpop.eup %1258 }
 0x1f6   : > { %v788_v29 = vmul.f32 %v1259_v28, %v786_v27 }
 0x1f8   : > { %790 = vrot.lane.b32.xlu0 %v788_v29, %s1596_s10 }
 0x26a   : > { %v791_v31 = vpop.permute.xlu0 %790 }
 0x26b   : > { %v793_v32 = vadd.f32 %v791_v31, %v1879_v23 }
 0x26d   : > { %798 = vrot.lane.b32.xlu1 %v793_v32, %s1596_s10  ;;  %s920_s10 = scalar_lea.sflag [#allocation4], %s1817_s15 }
 0x2df   : > { %v799_v35 = vpop.permute.xlu1 %798 }
 0x2e0   : > { %1123 = vmatmul.msk.f32.vlgmr.msra.gmra.mxu3 %vm800_vm2, %v799_v35 }
 0x2e8   : > { %1124 = vmatmul.msk.f32.vlgmr.msrb.gmra.mxu3 %vm823_vm3, %v682_v36 }
 0x363   : > { %v820_v43 = vpop.f32.mrf.mxu3 }
 0x36b   : > { %v844_v45 = vpop.f32.mrf.mxu3 }
 0x36c   : > { %v845_v46 = vadd.f32 %v844_v45, %v820_v43 }
 0x36e   : > { %v851_v47 = vadd.f32 %v1255_v44, %v845_v46 }
 0x370   : > { %v852_v48 = vmax.f32 %v851_v47, 0.0 }
 0x372   : > { %1125 = vmatmul.msk.f32.vlgmr.msrb.gmra.mxu0 %vm724_vm1, %v852_v48 }
 0x3ef   : > { %v881_v52 = vpop.f32.mrf.mxu0 }
 0x3f0   : > { %v882_v53 = vadd.f32 %v1256_v51, %v881_v52 }
 0x3f2   : > { %v884_v54 = vmax.f32 %v882_v53, 0.0 }
 0x3f4   : > { %1126 = vmatmul.msk.f32.vlgmr.msrb.gmra.mxu1 %vm724_vm1, %v884_v54 }
 0x471   : > { %v913_v56 = vpop.f32.mrf.mxu1 }
 0x472   : > { %v914_v57 = vadd.f32 %v1257_v55, %v913_v56 }
 0x474   : > { %1260 = vtanh.f32 %v914_v57 }
 0x47a   : > { %v1261_v58 = vpop.eup %1260 }
 0x47b   : > { %v917_v59 = vadd.f32 %v1261_v58, %v1879_v23 }
 0x47d   : > { %918 = vst [vmem:[%s672_s6] sm:$0xff] %v917_v59 }
 0x47e   : > { %1529 = shalt.err (!%p1526_p9)
}
 0x47f   : > { %1161 = dma.vmem_to_hbm [thread:$0]  (%p1786_p12), %s933_s30, 128, %s935_s8, %s920_s10  }
 0x480 PF: > { %p1208_p10 = scmp.ge.s32.totalorder %s1584_s24, 2  ;;  %s946_s15 = sand.u32 1, %s1572_s21  }
 0x481   : > { %s947_s16 = scalar_lea.sflag [#allocation4], %s946_s15 }
 0x482   : > { %p1190_p13 = pnand %p1208_p10, %p1791_p2 }
 0x484   : > { %p1191_p0 = pneg %p1190_p13 }
 0x486   : > { %1567 = dma.done.wait (%p1191_p0), %s947_s16, 128  }
 0x487   : > { %1569 = vsyncadd (%p1191_p0), %s947_s16, 4294967168  ;;  %p33_p4 = scmp.ge.s32.totalorder %s1766_s27, 5   ;;  %s1987_s21 = smov %s1576_s22 }
 0x488   : > { %s1988_s22 = smov %s1580_s23  ;;  %s1989_s23 = smov %s1778_s19 }
 0x489   : > { %s1990_s24 = smov %s1766_s27  ;;  %35 = sbr.rel (!%p33_p4) target bundleno = 21 (0x15), region = 163 }
 0x48e   :  { %953 = vsyncpa [#allocation3], 1 }
 0x48f   :  { %955 = vsyncpa [#allocation3 + $0x1], 1 }
 0x490   :  { %956 = vsyncpa [#allocation6], 1 }
 0x491   :  { %957 = vsyncpa [#allocation9], 1 }
 0x492   :  { %958 = vsyncpa [#allocation12], 1 }
 0x493   :  { %959 = vsyncpa [#allocation15], 1 }
 0x494   :  { %960 = vsyncpa [#allocation4], 1 }
 0x495   :  { %962 = vsyncpa [#allocation4 + $0x1], 1 }

</bundles_post_ra>
